<compile_context>
chip_gen: v7x
topology: tpu7x:2x2x1
jax: 0.10.0
libtpu: 0.0.40
codegen_flags: <defaults>
</compile_context>

<pallas_src>
import functools

import jax
import jax.numpy as jnp
from jax.experimental import pallas as pl
from jax.experimental.pallas import tpu as pltpu


def _round_up(x: int, m: int) -> int:
    return ((x + m - 1) // m) * m


def _vmem_budget_bytes() -> int:
    """Generation-aware VMEM budget (~75% of physical, headroom for Mosaic)."""
    try:
        cap = pltpu.get_tpu_info().vmem_capacity_bytes
    except Exception:
        cap = 64 * 1024 * 1024  # conservative v7x fallback
    return int(cap * 0.75)


# ---------------------------------------------------------------------------
# Generic tiled linear:  out = act @ weight^T + bias   (weight pre-transposed)
# ---------------------------------------------------------------------------
def _linear_kernel(act_ref, wt_ref, bias_ref, out_ref):
    """One (TM, TN) f32 output tile, accumulated directly in the output block.

    act_ref  : (TM, TK) activation tile
    wt_ref   : (TK, TN) pre-transposed weight tile (lane-dense, feeds MXU directly)
    bias_ref : (1, TN)
    out_ref  : (TM, TN) f32, VMEM-resident across the K grid axis
    """
    k = pl.program_id(2)

    @pl.when(k == 0)
    def _init():
        out_ref[...] = jnp.broadcast_to(
            bias_ref[...].astype(out_ref.dtype), out_ref.shape
        )

    out_ref[...] += jnp.dot(
        act_ref[...], wt_ref[...], preferred_element_type=jnp.float32
    )


def tiled_linear(act, weight, bias, *, tm_cap=512, tn_cap=512, tk_cap=1024,
                 compute_dtype=None):
    """out = act @ weight.T + bias as a tiled, pipelined Pallas matmul.

    act: (M, K)  weight: (N, K)  bias: (N,)  ->  (M, N) in act.dtype.
    compute_dtype: optionally cast act/weight (e.g. jnp.bfloat16) for MXU peak;
    accumulation stays f32.
    """
    M, K = act.shape
    N, Kw = weight.shape
    assert K == Kw and bias.shape == (N,)

    cdt = compute_dtype if compute_dtype is not None else act.dtype
    isz = jnp.dtype(cdt).itemsize

    # MXU / vreg aligned tiles (sublanes x8, lanes x128), shrunk if the
    # double-buffered footprint would exceed this generation's VMEM budget.
    tm = min(_round_up(M, 8), tm_cap)
    tn = min(_round_up(N, 128), tn_cap)
    tk = min(_round_up(K, 128), tk_cap)

    budget = _vmem_budget_bytes()

    def footprint(tm_, tn_, tk_):
        # double-buffered act/weight/bias tiles (compute dtype) + f32 out tile
        return 2 * ((tm_ * tk_ + tk_ * tn_ + tn_) * isz + tm_ * tn_ * 4)

    while footprint(tm, tn, tk) > budget and tk > 128:
        tk = max(128, _round_up(tk // 2, 128))
    while footprint(tm, tn, tk) > budget and tn > 128:
        tn = max(128, _round_up(tn // 2, 128))
    while footprint(tm, tn, tk) > budget and tm > 8:
        tm = max(8, _round_up(tm // 2, 8))

    mp, np_, kp = _round_up(M, tm), _round_up(N, tn), _round_up(K, tk)

    # Pad only when a remainder exists (zeros contribute nothing to the dot).
    act_p = act if (mp == M and kp == K) else jnp.pad(act, ((0, mp - M), (0, kp - K)))
    # Pre-transpose the weight ONCE to (K, N): no per-tile XLU transpose in-kernel.
    w_t = weight.T
    w_p = w_t if (kp == K and np_ == N) else jnp.pad(w_t, ((0, kp - K), (0, np_ - N)))
    b_p = (bias if np_ == N else jnp.pad(bias, (0, np_ - N))).reshape(1, np_)

    if compute_dtype is not None:
        act_p = act_p.astype(compute_dtype)
        w_p = w_p.astype(compute_dtype)

    grid = (mp // tm, np_ // tn, kp // tk)

    # Bytes accessed accounts for re-streaming: act is re-read once per j tile,
    # the weight once per i tile; bias is tiny; output written once (f32).
    cost = pl.CostEstimate(
        flops=2 * mp * np_ * kp,
        transcendentals=0,
        bytes_accessed=(mp * kp * (np_ // tn) + kp * np_ * (mp // tm)) * isz
        + np_ * (mp // tm) * 4
        + mp * np_ * 4,
    )

    out_p = pl.pallas_call(
        _linear_kernel,
        out_shape=jax.ShapeDtypeStruct((mp, np_), jnp.float32),
        grid_spec=pltpu.PrefetchScalarGridSpec(
            num_scalar_prefetch=0,
            grid=grid,
            in_specs=[
                pl.BlockSpec((tm, tk), lambda i, j, k: (i, k)),  # activations
                pl.BlockSpec((tk, tn), lambda i, j, k: (k, j)),  # weight^T (K, N)
                pl.BlockSpec((1, tn), lambda i, j, k: (0, j)),   # bias row
            ],
            out_specs=pl.BlockSpec((tm, tn), lambda i, j, k: (i, j)),
        ),
        compiler_params=pltpu.CompilerParams(
            dimension_semantics=("parallel", "parallel", "arbitrary"),
            vmem_limit_bytes=budget,
        ),
        cost_estimate=cost,
    )(act_p, w_p, b_p)

    out = out_p if (mp == M and np_ == N) else out_p[:M, :N]
    return out.astype(act.dtype)


# ---------------------------------------------------------------------------
# Fused small-shape path: all three GEMMs in ONE pallas_call, b stays in VMEM.
# ---------------------------------------------------------------------------
def _fused_kernel(x_ref, y_ref, w1t_ref, b1_ref, w2t_ref, b2_ref, w3t_ref, b3_ref,
                  a_ref, c_ref):
    a_ref[...] = (
        jnp.dot(x_ref[...], w1t_ref[...], preferred_element_type=jnp.float32)
        + b1_ref[...].astype(jnp.float32)
    )
    # Intermediate b never leaves VMEM / vregs.
    b = (
        jnp.dot(y_ref[...], w2t_ref[...], preferred_element_type=jnp.float32)
        + b2_ref[...].astype(jnp.float32)
    )
    c_ref[...] = (
        jnp.dot(b.astype(w3t_ref.dtype), w3t_ref[...],
                preferred_element_type=jnp.float32)
        + b3_ref[...].astype(jnp.float32)
    )


def fused_parallel_sequential(x, y, w1, b1, w2, b2, w3, b3):
    B, I = x.shape
    H = w1.shape[0]
    O = w3.shape[0]

    bp = _round_up(B, 8)
    ip = _round_up(I, 128)
    hp = _round_up(H, 128)
    op = _round_up(O, 128)

    def pad2(m, r, c):
        if m.shape == (r, c):
            return m
        return jnp.pad(m, ((0, r - m.shape[0]), (0, c - m.shape[1])))

    x_p = pad2(x, bp, ip)
    y_p = pad2(y, bp, ip)
    w1t = pad2(w1.T, ip, hp)
    w2t = pad2(w2.T, ip, hp)
    w3t = pad2(w3.T, hp, op)
    b1p = jnp.pad(b1, (0, hp - H)).reshape(1, hp)
    b2p = jnp.pad(b2, (0, hp - H)).reshape(1, hp)
    b3p = jnp.pad(b3, (0, op - O)).reshape(1, op)

    def full(shape):
        return pl.BlockSpec(shape, lambda i: (0, 0))

    a_p, c_p = pl.pallas_call(
        _fused_kernel,
        out_shape=(
            jax.ShapeDtypeStruct((bp, hp), jnp.float32),
            jax.ShapeDtypeStruct((bp, op), jnp.float32),
        ),
        grid_spec=pltpu.PrefetchScalarGridSpec(
            num_scalar_prefetch=0,
            grid=(1,),
            in_specs=[
                full((bp, ip)), full((bp, ip)),
                full((ip, hp)), full((1, hp)),
                full((ip, hp)), full((1, hp)),
                full((hp, op)), full((1, op)),
            ],
            out_specs=(full((bp, hp)), full((bp, op))),
        ),
        compiler_params=pltpu.CompilerParams(
            dimension_semantics=("arbitrary",),
        ),
    )(x_p, y_p, w1t, b1p, w2t, b2p, w3t, b3p)

    a = a_p[:B, :H].astype(x.dtype)
    c = c_p[:B, :O].astype(x.dtype)
    return a, c


@jax.jit
def linear_parallel_sequential(x, y, w1, b1, w2, b2, w3, b3):
    """x,y: (B, I). w1,w2: (H, I). b1,b2: (H,). w3: (O, H). b3: (O,)."""
    B, I = x.shape
    H = w1.shape[0]
    O = w3.shape[0]
    # If everything pads into a single modest tile, use the fully-fused kernel
    # (one launch, intermediate b kept in VMEM). Otherwise fall back to the
    # generic tiled/pipelined GEMM per layer.
    small = max(_round_up(B, 8), _round_up(I, 128),
                _round_up(H, 128), _round_up(O, 128)) <= 512
    if small:
        return fused_parallel_sequential(x, y, w1, b1, w2, b2, w3, b3)
    a = tiled_linear(x, w1, b1)
    b = tiled_linear(y, w2, b2)
    c = tiled_linear(b, w3, b3)
    return a, c


if __name__ == "__main__":
    # Shapes implied by the module defaults: in_size=2, input_size=4,
    # intermediate_size=5, output_size=3.
    in_size, input_size, intermediate_size, output_size = 2, 4, 5, 3

    key = jax.random.PRNGKey(0)
    kx, ky, k1w, k1b, k2w, k2b, k3w, k3b = jax.random.split(key, 8)

    x = jax.random.uniform(kx, (in_size, input_size), dtype=jnp.float32)
    y = jax.random.uniform(ky, (in_size, input_size), dtype=jnp.float32)

    # "torch.rand"-style parameter init (uniform [0, 1)).
    w1 = jax.random.uniform(k1w, (intermediate_size, input_size), dtype=jnp.float32)
    b1 = jax.random.uniform(k1b, (intermediate_size,), dtype=jnp.float32)
    w2 = jax.random.uniform(k2w, (intermediate_size, input_size), dtype=jnp.float32)
    b2 = jax.random.uniform(k2b, (intermediate_size,), dtype=jnp.float32)
    w3 = jax.random.uniform(k3w, (output_size, intermediate_size), dtype=jnp.float32)
    b3 = jax.random.uniform(k3b, (output_size,), dtype=jnp.float32)

    a, c = linear_parallel_sequential(x, y, w1, b1, w2, b2, w3, b3)
    jax.block_until_ready((a, c))

    # Reference check in plain JAX (module forward).
    a_ref = x @ w1.T + b1
    b_ref = y @ w2.T + b2
    c_ref = b_ref @ w3.T + b3

    assert a.shape == (in_size, intermediate_size)
    assert c.shape == (in_size, output_size)
    assert jnp.allclose(a, a_ref, rtol=1e-2, atol=1e-2), "a mismatch"
    assert jnp.allclose(c, c_ref, rtol=1e-2, atol=1e-2), "c mismatch"

    # Also exercise the generic tiled path (multi-tile grid) on a small GEMM.
    km = jax.random.PRNGKey(1)
    ka, kw, kb = jax.random.split(km, 3)
    act = jax.random.uniform(ka, (64, 512), dtype=jnp.float32)
    wgt = jax.random.uniform(kw, (256, 512), dtype=jnp.float32)
    bia = jax.random.uniform(kb, (256,), dtype=jnp.float32)
    tiled = jax.jit(
        lambda a_, w_, b_: tiled_linear(a_, w_, b_, tm_cap=128, tn_cap=128, tk_cap=128)
    )(act, wgt, bia)
    jax.block_until_ready(tiled)
    tiled_ref = act @ wgt.T + bia
    assert jnp.allclose(tiled, tiled_ref, rtol=2e-2, atol=2e-2), "tiled mismatch"

    print("KERNEL_OK")
</pallas_src>

<mosaic_0001>
module attributes {stable_mosaic.version = 11 : i64} {
  func.func @_fused_kernel(%arg0: i32, %arg1: memref<8x128xf32, #tpu.memory_space<vmem>>, %arg2: memref<8x128xf32, #tpu.memory_space<vmem>>, %arg3: memref<128x128xf32, #tpu.memory_space<vmem>>, %arg4: memref<1x128xf32, #tpu.memory_space<vmem>>, %arg5: memref<128x128xf32, #tpu.memory_space<vmem>>, %arg6: memref<1x128xf32, #tpu.memory_space<vmem>>, %arg7: memref<128x128xf32, #tpu.memory_space<vmem>>, %arg8: memref<1x128xf32, #tpu.memory_space<vmem>>, %arg9: memref<8x128xf32, #tpu.memory_space<vmem>>, %arg10: memref<8x128xf32, #tpu.memory_space<vmem>>) attributes {dimension_semantics = [#tpu.dimension_semantics<arbitrary>], iteration_bounds = array<i64: 1>, scalar_prefetch = 0 : i64, scratch_operands = 0 : i64, tpu.core_type = #tpu.core_type<tc>, window_params = [{pipeline_mode = #tpu.pipeline_mode<synchronous>, transform_indices = @transform_0, window_bounds = array<i64: 8, 128>}, {pipeline_mode = #tpu.pipeline_mode<synchronous>, transform_indices = @transform_1, window_bounds = array<i64: 8, 128>}, {pipeline_mode = #tpu.pipeline_mode<synchronous>, transform_indices = @transform_2, window_bounds = array<i64: 128, 128>}, {pipeline_mode = #tpu.pipeline_mode<synchronous>, transform_indices = @transform_3, window_bounds = array<i64: 1, 128>}, {pipeline_mode = #tpu.pipeline_mode<synchronous>, transform_indices = @transform_4, window_bounds = array<i64: 128, 128>}, {pipeline_mode = #tpu.pipeline_mode<synchronous>, transform_indices = @transform_5, window_bounds = array<i64: 1, 128>}, {pipeline_mode = #tpu.pipeline_mode<synchronous>, transform_indices = @transform_6, window_bounds = array<i64: 128, 128>}, {pipeline_mode = #tpu.pipeline_mode<synchronous>, transform_indices = @transform_7, window_bounds = array<i64: 1, 128>}, {pipeline_mode = #tpu.pipeline_mode<synchronous>, transform_indices = @transform_8, window_bounds = array<i64: 8, 128>}, {pipeline_mode = #tpu.pipeline_mode<synchronous>, transform_indices = @transform_9, window_bounds = array<i64: 8, 128>}]} {
    %c0 = arith.constant 0 : index
    %c0_0 = arith.constant 0 : index
    %0 = vector.load %arg1[%c0, %c0_0] : memref<8x128xf32, #tpu.memory_space<vmem>>, vector<8x128xf32>
    %c0_1 = arith.constant 0 : index
    %c0_2 = arith.constant 0 : index
    %1 = vector.load %arg3[%c0_1, %c0_2] : memref<128x128xf32, #tpu.memory_space<vmem>>, vector<128x128xf32>
    %cst = arith.constant dense<0.000000e+00> : vector<8x128xf32>
    %2 = tpu.matmul %0, %1, %cst {dimension_numbers = #tpu.dot_dimension_numbers<[1], [0], [0], [1], [0, 0, 1, 1], [], []>} : vector<8x128xf32>, vector<128x128xf32>, vector<8x128xf32> -> vector<8x128xf32>
    %c0_3 = arith.constant 0 : index
    %c0_4 = arith.constant 0 : index
    %3 = vector.load %arg4[%c0_3, %c0_4] : memref<1x128xf32, #tpu.memory_space<vmem>>, vector<1x128xf32>
    %4 = vector.broadcast %3 : vector<1x128xf32> to vector<8x128xf32>
    %5 = arith.addf %2, %4 : vector<8x128xf32>
    %c0_5 = arith.constant 0 : index
    %c0_6 = arith.constant 0 : index
    %6 = vector.load %arg9[%c0_5, %c0_6] : memref<8x128xf32, #tpu.memory_space<vmem>>, vector<8x128xf32>
    tpu.vector_store %arg9[%c0_5, %c0_6], %5 {strides = array<i32>} : memref<8x128xf32, #tpu.memory_space<vmem>>, vector<8x128xf32>,
    %c0_7 = arith.constant 0 : index
    %c0_8 = arith.constant 0 : index
    %7 = vector.load %arg2[%c0_7, %c0_8] : memref<8x128xf32, #tpu.memory_space<vmem>>, vector<8x128xf32>
    %c0_9 = arith.constant 0 : index
    %c0_10 = arith.constant 0 : index
    %8 = vector.load %arg5[%c0_9, %c0_10] : memref<128x128xf32, #tpu.memory_space<vmem>>, vector<128x128xf32>
    %cst_11 = arith.constant dense<0.000000e+00> : vector<8x128xf32>
    %9 = tpu.matmul %7, %8, %cst_11 {dimension_numbers = #tpu.dot_dimension_numbers<[1], [0], [0], [1], [0, 0, 1, 1], [], []>} : vector<8x128xf32>, vector<128x128xf32>, vector<8x128xf32> -> vector<8x128xf32>
    %c0_12 = arith.constant 0 : index
    %c0_13 = arith.constant 0 : index
    %10 = vector.load %arg6[%c0_12, %c0_13] : memref<1x128xf32, #tpu.memory_space<vmem>>, vector<1x128xf32>
    %11 = vector.broadcast %10 : vector<1x128xf32> to vector<8x128xf32>
    %12 = arith.addf %9, %11 : vector<8x128xf32>
    %c0_14 = arith.constant 0 : index
    %c0_15 = arith.constant 0 : index
    %13 = vector.load %arg7[%c0_14, %c0_15] : memref<128x128xf32, #tpu.memory_space<vmem>>, vector<128x128xf32>
    %cst_16 = arith.constant dense<0.000000e+00> : vector<8x128xf32>
    %14 = tpu.matmul %12, %13, %cst_16 {dimension_numbers = #tpu.dot_dimension_numbers<[1], [0], [0], [1], [0, 0, 1, 1], [], []>} : vector<8x128xf32>, vector<128x128xf32>, vector<8x128xf32> -> vector<8x128xf32>
    %c0_17 = arith.constant 0 : index
    %c0_18 = arith.constant 0 : index
    %15 = vector.load %arg8[%c0_17, %c0_18] : memref<1x128xf32, #tpu.memory_space<vmem>>, vector<1x128xf32>
    %16 = vector.broadcast %15 : vector<1x128xf32> to vector<8x128xf32>
    %17 = arith.addf %14, %16 : vector<8x128xf32>
    %c0_19 = arith.constant 0 : index
    %c0_20 = arith.constant 0 : index
    %18 = vector.load %arg10[%c0_19, %c0_20] : memref<8x128xf32, #tpu.memory_space<vmem>>, vector<8x128xf32>
    tpu.vector_store %arg10[%c0_19, %c0_20], %17 {strides = array<i32>} : memref<8x128xf32, #tpu.memory_space<vmem>>, vector<8x128xf32>,
    return
  }
  func.func @transform_0(%arg0: i32) -> (i32, i32) {
    %c0_i32 = arith.constant 0 : i32
    %c0_i32_0 = arith.constant 0 : i32
    %c0_i32_1 = arith.constant 0 : i32
    return %c0_i32, %c0_i32_0 : i32, i32
  }
  func.func @transform_1(%arg0: i32) -> (i32, i32) {
    %c0_i32 = arith.constant 0 : i32
    %c0_i32_0 = arith.constant 0 : i32
    %c0_i32_1 = arith.constant 0 : i32
    return %c0_i32, %c0_i32_0 : i32, i32
  }
  func.func @transform_2(%arg0: i32) -> (i32, i32) {
    %c0_i32 = arith.constant 0 : i32
    %c0_i32_0 = arith.constant 0 : i32
    %c0_i32_1 = arith.constant 0 : i32
    return %c0_i32, %c0_i32_0 : i32, i32
  }
  func.func @transform_3(%arg0: i32) -> (i32, i32) {
    %c0_i32 = arith.constant 0 : i32
    %c0_i32_0 = arith.constant 0 : i32
    %c0_i32_1 = arith.constant 0 : i32
    return %c0_i32, %c0_i32_0 : i32, i32
  }
  func.func @transform_4(%arg0: i32) -> (i32, i32) {
    %c0_i32 = arith.constant 0 : i32
    %c0_i32_0 = arith.constant 0 : i32
    %c0_i32_1 = arith.constant 0 : i32
    return %c0_i32, %c0_i32_0 : i32, i32
  }
  func.func @transform_5(%arg0: i32) -> (i32, i32) {
    %c0_i32 = arith.constant 0 : i32
    %c0_i32_0 = arith.constant 0 : i32
    %c0_i32_1 = arith.constant 0 : i32
    return %c0_i32, %c0_i32_0 : i32, i32
  }
  func.func @transform_6(%arg0: i32) -> (i32, i32) {
    %c0_i32 = arith.constant 0 : i32
    %c0_i32_0 = arith.constant 0 : i32
    %c0_i32_1 = arith.constant 0 : i32
    return %c0_i32, %c0_i32_0 : i32, i32
  }
  func.func @transform_7(%arg0: i32) -> (i32, i32) {
    %c0_i32 = arith.constant 0 : i32
    %c0_i32_0 = arith.constant 0 : i32
    %c0_i32_1 = arith.constant 0 : i32
    return %c0_i32, %c0_i32_0 : i32, i32
  }
  func.func @transform_8(%arg0: i32) -> (i32, i32) {
    %c0_i32 = arith.constant 0 : i32
    %c0_i32_0 = arith.constant 0 : i32
    %c0_i32_1 = arith.constant 0 : i32
    return %c0_i32, %c0_i32_0 : i32, i32
  }
  func.func @transform_9(%arg0: i32) -> (i32, i32) {
    %c0_i32 = arith.constant 0 : i32
    %c0_i32_0 = arith.constant 0 : i32
    %c0_i32_1 = arith.constant 0 : i32
    return %c0_i32, %c0_i32_0 : i32, i32
  }
}

</mosaic_0001>

<bundles_post_ra>
// kernel: linear_parallel_sequential.1
= control target key start
LH: loop header
LB: loop body
LE: loop exit
PB: predicated region body
PF: predicated region fallthrough
CT: control target
= control target key end

     0   :  { %v556_v0 = vmov 0.0|0.0   ;;  %vm557_vm0 = vmmov 0   ;;  %v558_v4 = vmov 0.0   ;;  %s804_s4 = inlined_call_operand.vmem [shape: f32[128,128], index: 4, kind: input, shape index: {}]   ;;  %s805_s2 = inlined_call_operand.vmem [shape: f32[128,128], index: 2, kind: input, shape index: {}]   ;;  %s806_s1 = inlined_call_operand.vmem [shape: f32[8,128], index: 1, kind: input, shape index: {}]   ;;  %s807_s6 = inlined_call_operand.vmem [shape: f32[128,128], index: 6, kind: input, shape index: {}]   ;;  %s808_s0 = inlined_call_operand.vmem [shape: f32[8,128], index: 0, kind: input, shape index: {}]   ;;  %s809_s5 = inlined_call_operand.vmem [shape: f32[1,128], index: 5, kind: input, shape index: {}]   ;;  %s810_s3 = inlined_call_operand.vmem [shape: f32[1,128], index: 3, kind: input, shape index: {}]   ;;  %s811_s8 = inlined_call_operand.vmem [shape: f32[8,128], index: 8, kind: output, shape index: {0}]   ;;  %s812_s7 = inlined_call_operand.vmem [shape: f32[1,128], index: 7, kind: input, shape index: {}]   ;;  %s813_s9 = inlined_call_operand.vmem [shape: f32[8,128], index: 9, kind: output, shape index: {1}]  }
   0x1   :  { %505 = vmatprep.subr.bf16.mxu1 %v556_v0  ;;  %v127_v1 = vld [vmem:[%s804_s4] sm:$0xff]  ;;  %v128_v2 = vld [vmem:[%s804_s4 + $0x8] sm:$0xff]  ;;  %v129_v3 = vld [vmem:[%s804_s4 + $0x10] sm:$0xff]  ;;  %443 = vmatprep.mubr.msk.f32.mxu1 %vm557_vm0, %v558_v4 }
   0x2   :  { %v506_v5 = vpack.c.bf16 %v128_v2, %v127_v1  ;;  %v130_v6 = vld [vmem:[%s804_s4 + $0x18] sm:$0xff]  ;;  %481 = vmatprep.subr.bf16.mxu0 %v556_v0  ;;  %408 = vmatprep.mubr.msk.f32.mxu0 %vm557_vm0, %v558_v4  ;;  %v131_v8 = vld [vmem:[%s804_s4 + $0x20] sm:$0xff]  ;;  %v132_v9 = vld [vmem:[%s804_s4 + $0x28] sm:$0xff] }
   0x3   :  { %v509_v7 = vpack.c.bf16 %v130_v6, %v129_v3  ;;  %v32_v10 = vld [vmem:[%s805_s2] sm:$0xff]  ;;  %v33_v11 = vld [vmem:[%s805_s2 + $0x8] sm:$0xff]  ;;  %v34_v12 = vld [vmem:[%s805_s2 + $0x10] sm:$0xff]  ;;  %v512_v14 = vpack.c.bf16 %v132_v9, %v131_v8 }
   0x4   :  { %507 = vmatpush3.bf16.msra.mxu1 %v506_v5  ;;  %v35_v13 = vld [vmem:[%s805_s2 + $0x18] sm:$0xff]  ;;  %v482_v15 = vpack.c.bf16 %v33_v11, %v32_v10  ;;  %v133_v16 = vld [vmem:[%s804_s4 + $0x30] sm:$0xff]  ;;  %v36_v19 = vld [vmem:[%s805_s2 + $0x20] sm:$0xff] }
   0x5   :  { %508 = vmatprep.subr.bf16.mxu1 %v556_v0  ;;  %v134_v17 = vld [vmem:[%s804_s4 + $0x38] sm:$0xff]  ;;  %v485_v18 = vpack.c.bf16 %v35_v13, %v34_v12  ;;  %v37_v20 = vld [vmem:[%s805_s2 + $0x28] sm:$0xff]  ;;  %v135_v22 = vld [vmem:[%s804_s4 + $0x40] sm:$0xff] }
   0x6   :  { %483 = vmatpush3.bf16.msra.mxu0 %v482_v15  ;;  %v515_v21 = vpack.c.bf16 %v134_v17, %v133_v16  ;;  %v136_v23 = vld [vmem:[%s804_s4 + $0x48] sm:$0xff]  ;;  %v488_v24 = vpack.c.bf16 %v37_v20, %v36_v19  ;;  %v38_v25 = vld [vmem:[%s805_s2 + $0x30] sm:$0xff]  ;;  %v39_v26 = vld [vmem:[%s805_s2 + $0x38] sm:$0xff] }
   0x7   :  { %484 = vmatprep.subr.bf16.mxu0 %v556_v0  ;;  %v518_v27 = vpack.c.bf16 %v136_v23, %v135_v22  ;;  %v137_v28 = vld [vmem:[%s804_s4 + $0x50] sm:$0xff]  ;;  %v138_v29 = vld [vmem:[%s804_s4 + $0x58] sm:$0xff]  ;;  %v491_v30 = vpack.c.bf16 %v39_v26, %v38_v25  ;;  %v40_v31 = vld [vmem:[%s805_s2 + $0x40] sm:$0xff] }
   0x8   :  { %510 = vmatpush3.bf16.msra.mxu1 %v509_v7  ;;  %v41_v32 = vld [vmem:[%s805_s2 + $0x48] sm:$0xff]  ;;  %v521_v33 = vpack.c.bf16 %v138_v29, %v137_v28  ;;  %v139_v34 = vld [vmem:[%s804_s4 + $0x60] sm:$0xff]  ;;  %v42_v37 = vld [vmem:[%s805_s2 + $0x50] sm:$0xff] }
   0x9   :  { %511 = vmatprep.subr.bf16.mxu1 %v556_v0  ;;  %v140_v35 = vld [vmem:[%s804_s4 + $0x68] sm:$0xff]  ;;  %v494_v36 = vpack.c.bf16 %v41_v32, %v40_v31  ;;  %v43_v38 = vld [vmem:[%s805_s2 + $0x58] sm:$0xff]  ;;  %v141_v40 = vld [vmem:[%s804_s4 + $0x70] sm:$0xff] }
   0xa   :  { %486 = vmatpush3.bf16.msra.mxu0 %v485_v18  ;;  %v524_v39 = vpack.c.bf16 %v140_v35, %v139_v34  ;;  %v142_v41 = vld [vmem:[%s804_s4 + $0x78] sm:$0xff]  ;;  %v497_v42 = vpack.c.bf16 %v43_v38, %v42_v37  ;;  %v44_v43 = vld [vmem:[%s805_s2 + $0x60] sm:$0xff]  ;;  %v45_v44 = vld [vmem:[%s805_s2 + $0x68] sm:$0xff] }
   0xb   :  { %487 = vmatprep.subr.bf16.mxu0 %v556_v0  ;;  %v527_v45 = vpack.c.bf16 %v142_v41, %v141_v40  ;;  %v500_v46 = vpack.c.bf16 %v45_v44, %v44_v43  ;;  %v46_v47 = vld [vmem:[%s805_s2 + $0x70] sm:$0xff]  ;;  %v47_v48 = vld [vmem:[%s805_s2 + $0x78] sm:$0xff]  ;;  %v126_v49 = vld [vmem:[%s806_s1] sm:$0xff] }
   0xc   :  { %513 = vmatpush3.bf16.msra.mxu1 %v512_v14  ;;  %v503_v50 = vpack.c.bf16 %v47_v48, %v46_v47  ;;  %v220_v51 = vld [vmem:[%s807_s6] sm:$0xff]  ;;  %v221_v52 = vld [vmem:[%s807_s6 + $0x8] sm:$0xff]  ;;  %v222_v55 = vld [vmem:[%s807_s6 + $0x10] sm:$0xff] }
   0xd   :  { %514 = vmatprep.subr.bf16.mxu1 %v556_v0  ;;  %v31_v53 = vld [vmem:[%s808_s0] sm:$0xff]  ;;  %v530_v54 = vpack.c.bf16 %v221_v52, %v220_v51  ;;  %v223_v56 = vld [vmem:[%s807_s6 + $0x18] sm:$0xff]  ;;  %v225_v59 = vld [vmem:[%s807_s6 + $0x28] sm:$0xff] }
   0xe   :  { %489 = vmatpush3.bf16.msra.mxu0 %v488_v24  ;;  %v533_v57 = vpack.c.bf16 %v223_v56, %v222_v55  ;;  %v224_v58 = vld [vmem:[%s807_s6 + $0x20] sm:$0xff]  ;;  %v226_v61 = vld [vmem:[%s807_s6 + $0x30] sm:$0xff]  ;;  %v227_v62 = vld [vmem:[%s807_s6 + $0x38] sm:$0xff] }
   0xf   :  { %490 = vmatprep.subr.bf16.mxu0 %v556_v0  ;;  %v536_v60 = vpack.c.bf16 %v225_v59, %v224_v58  ;;  %v539_v63 = vpack.c.bf16 %v227_v62, %v226_v61  ;;  %v228_v1 = vld [vmem:[%s807_s6 + $0x40] sm:$0xff]  ;;  %v229_v2 = vld [vmem:[%s807_s6 + $0x48] sm:$0xff]  ;;  %v231_v5 = vld [vmem:[%s807_s6 + $0x58] sm:$0xff] }
  0x10   :  { %516 = vmatpush3.bf16.msra.mxu1 %v515_v21  ;;  %v542_v3 = vpack.c.bf16 %v229_v2, %v228_v1  ;;  %v232_v7 = vld [vmem:[%s807_s6 + $0x60] sm:$0xff]  ;;  %v233_v8 = vld [vmem:[%s807_s6 + $0x68] sm:$0xff]  ;;  %v234_v10 = vld [vmem:[%s807_s6 + $0x70] sm:$0xff] }
  0x11   :  { %517 = vmatprep.subr.bf16.mxu1 %v556_v0  ;;  %v548_v9 = vpack.c.bf16 %v233_v8, %v232_v7  ;;  %v235_v11 = vld [vmem:[%s807_s6 + $0x78] sm:$0xff]  ;;  %v323_v13 = vld [vmem:[%s809_s5] ss:$0 sm:$0xff] }
  0x12   :  { %492 = vmatpush3.bf16.msra.mxu0 %v491_v30  ;;  %v551_v12 = vpack.c.bf16 %v235_v11, %v234_v10  ;;  %v324_v20 = vld [vmem:[%s812_s7] ss:$0 sm:$0xff] }
  0x13   :  { %493 = vmatprep.subr.bf16.mxu0 %v556_v0 }
  0x14   :  { %519 = vmatpush3.bf16.msra.mxu1 %v518_v27 }
  0x15   :  { %520 = vmatprep.subr.bf16.mxu1 %v556_v0 }
  0x16   :  { %495 = vmatpush3.bf16.msra.mxu0 %v494_v36 }
  0x17   :  { %496 = vmatprep.subr.bf16.mxu0 %v556_v0 }
  0x18   :  { %522 = vmatpush3.bf16.msra.mxu1 %v521_v33 }
  0x19   :  { %523 = vmatprep.subr.bf16.mxu1 %v556_v0 }
  0x1a   :  { %498 = vmatpush3.bf16.msra.mxu0 %v497_v42 }
  0x1b   :  { %499 = vmatprep.subr.bf16.mxu0 %v556_v0 }
  0x1c   :  { %525 = vmatpush3.bf16.msra.mxu1 %v524_v39 }
  0x1d   :  { %526 = vmatprep.subr.bf16.mxu1 %v556_v0 }
  0x1e   :  { %501 = vmatpush3.bf16.msra.mxu0 %v500_v46 }
  0x1f   :  { %502 = vmatprep.subr.bf16.mxu0 %v556_v0 }
  0x20   :  { %528 = vmatpush3.bf16.msra.mxu1 %v527_v45 }
  0x22   :  { %504 = vmatpush3.bf16.msra.mxu0 %v503_v50 }
  0x23   :  { %444 = vmatmul.mubr.f32.vlgmr.msra.gmra.mrb[0].mxu1 %v126_v49  ;;  %529 = vmatprep.subr.bf16.mxu0 %v556_v0 }
  0x25   :  { %409 = vmatmul.mubr.f32.vlgmr.msra.gmra.mrb[0].mxu0 %v31_v53 }
  0x26   :  { %531 = vmatpush3.bf16.msra.mxu0 %v530_v54  ;;  %478 = vmatprep.mubr.msk.f32.mxu0 %vm557_vm0, %v558_v4  ;;  %v230_v4 = vld [vmem:[%s807_s6 + $0x50] sm:$0xff] }
  0x27   :  { %532 = vmatprep.subr.bf16.mxu0 %v556_v0  ;;  %v545_v6 = vpack.c.bf16 %v231_v5, %v230_v4 }
  0x2a   :  { %534 = vmatpush3.bf16.msra.mxu0 %v533_v57 }
  0x2b   :  { %535 = vmatprep.subr.bf16.mxu0 %v556_v0 }
  0x2e   :  { %537 = vmatpush3.bf16.msra.mxu0 %v536_v60 }
  0x2f   :  { %538 = vmatprep.subr.bf16.mxu0 %v556_v0 }
  0x32   :  { %540 = vmatpush3.bf16.msra.mxu0 %v539_v63 }
  0x33   :  { %541 = vmatprep.subr.bf16.mxu0 %v556_v0 }
  0x36   :  { %543 = vmatpush3.bf16.msra.mxu0 %v542_v3 }
  0x37   :  { %544 = vmatprep.subr.bf16.mxu0 %v556_v0 }
  0x3a   :  { %546 = vmatpush3.bf16.msra.mxu0 %v545_v6 }
  0x3b   :  { %547 = vmatprep.subr.bf16.mxu0 %v556_v0 }
  0x3e   :  { %549 = vmatpush3.bf16.msra.mxu0 %v548_v9 }
  0x3f   :  { %550 = vmatprep.subr.bf16.mxu0 %v556_v0  ;;  %v322_v0 = vld [vmem:[%s810_s3] ss:$0 sm:$0xff] }
  0x42   :  { %552 = vmatpush3.bf16.msra.mxu0 %v551_v12 }
  0xf6   :  { %v216_v14 = vpop.f32.mrb[0].mxu1 }
  0xf7   :  { %v217_v15 = vadd.f32 %v323_v13, %v216_v14  ;;  %v445_v16 = vpop.f32.mrb[1].mxu1 }
  0xf8   :  { %v121_v17 = vpop.f32.mrb[0].mxu0 }
  0xf9   :  { %479 = vmatmul.mubr.f32.vlgmr.msra.gmra.mrb[2].mxu0 %v217_v15  ;;  %v122_v18 = vadd.f32 %v322_v0, %v121_v17  ;;  %v410_v19 = vpop.f32.mrb[1].mxu0 }
  0xfb   :  { %125 = vst [vmem:[%s811_s8] sm:$0xff] %v122_v18 }
 0x1cc   :  { %v309_v21 = vpop.f32.mrb[2].mxu0 }
 0x1cd   :  { %v310_v22 = vadd.f32 %v324_v20, %v309_v21  ;;  %v480_v23 = vpop.f32.mrb[3].mxu0 }
 0x1cf   :  { %313 = vst [vmem:[%s813_s9] sm:$0xff] %v310_v22 }

</bundles_post_ra>
